<compile_context>
chip_gen: v7x
topology: tpu7x:2x2x1
jax: 0.10.0
libtpu: 0.0.40
codegen_flags: <defaults>
</compile_context>

<pallas_src>
import jax
import jax.numpy as jnp
from jax.experimental import pallas as pl
from jax.experimental.pallas import tpu as pltpu


_NEG_SLOPE = 0.01
_ELU_ALPHA = 0.01
_ELU_BETA = 0.01


def _round_up(x, m):
    return (x + m - 1) // m * m


def _autoencoder_kernel(x_ref,
                        w1_ref, b1_ref,
                        w23_ref, b23_ref,
                        w4_ref, b4_ref,
                        o_ref):
    """Fused encoder+decoder for one batch tile (all operands VMEM-resident)."""
    neg = jnp.float32(_NEG_SLOPE)
    alpha = jnp.float32(_ELU_ALPHA)
    beta = jnp.float32(_ELU_BETA)

    # bf16 MXU operands, f32 accumulation / elementwise.
    x = x_ref[...].astype(jnp.bfloat16)

    # encoder[0]: Linear(input_dim -> hidden), K = true input_dim (no padding)
    h = jnp.dot(x, w1_ref[...], preferred_element_type=jnp.float32) + b1_ref[...]
    # encoder[1]: LeakyReLU(0.01)
    h = jnp.where(h > 0, h, neg * h)
    # encoder[2] + decoder[0] folded: Linear(hidden -> latent -> hidden)
    d = jnp.dot(h.astype(jnp.bfloat16), w23_ref[...],
                preferred_element_type=jnp.float32) + b23_ref[...]
    # decoder[1]: LeakyReLU(0.01)
    d = jnp.where(d > 0, d, neg * d)
    # decoder[2]: Linear(hidden -> input_dim), N = true input_dim (no padding)
    y = jnp.dot(d.astype(jnp.bfloat16), w4_ref[...],
                preferred_element_type=jnp.float32) + b4_ref[...]
    # decoder[3]: ELU(alpha=0.01) + 0.01
    # exp only sees non-positive values -> no inf on the unselected branch.
    y = jnp.where(y > 0, y, alpha * (jnp.exp(jnp.minimum(y, 0.0)) - 1.0)) + beta

    o_ref[...] = y.astype(o_ref.dtype)


def autoencoder_matrix_forward(x, params, *, batch_tile=None, out_dtype=jnp.float32):
    """Fused autoencoder forward pass with Pallas.

    x: (N, input_dim), float32 or bfloat16.
    params: dict w1,b1,w2,b2,w3,b3,w4,b4; weights (in, out), biases (1, out), f32.
    batch_tile: optional override of the batch tile size (rounded up to 8).
    out_dtype: output dtype (default f32; pass bf16 to halve the output stream
               on HBM-bound v6e/v7x if the caller tolerates it).
    """
    n, input_dim = x.shape
    hidden_dim = params["w1"].shape[1]

    # ---- weight prep: bf16 MXU operands, f32 biases, fold W2 @ W3 -----------
    w1 = params["w1"].astype(jnp.bfloat16)                               # (D, H)
    b1 = params["b1"].astype(jnp.float32)                                # (1, H)
    w23 = (params["w2"].astype(jnp.float32)
           @ params["w3"].astype(jnp.float32)).astype(jnp.bfloat16)      # (H, H)
    b23 = (params["b2"].astype(jnp.float32) @ params["w3"].astype(jnp.float32)
           + params["b3"].astype(jnp.float32))                           # (1, H)
    w4 = params["w4"].astype(jnp.bfloat16)                               # (H, D)
    b4 = params["b4"].astype(jnp.float32)                                # (1, D)

    weights = (w1, b1, w23, b23, w4, b4)

    # keep input dtype if it is already an MXU-friendly float, else promote
    x_p = x if x.dtype in (jnp.bfloat16, jnp.float32) else x.astype(jnp.float32)
    x_itemsize = jnp.dtype(x_p.dtype).itemsize
    out_itemsize = jnp.dtype(out_dtype).itemsize

    # ---- size the batch tile from the chip's VMEM capacity ------------------
    try:
        info = pltpu.get_tpu_info()
        vmem_cap = int(info.vmem_capacity_bytes)
        num_tc = int(getattr(info, "num_cores", 0)
                     or getattr(info, "tensorcores_per_chip", 0) or 1)
    except Exception:
        vmem_cap = 64 * 1024 * 1024  # v7x per-TC physical: safe lower bound
        num_tc = 1

    budget = int(vmem_cap * 0.70)

    # resident weight/bias blocks are double-buffer reserved by the pipeline
    resident = 2 * sum(int(a.size) * a.dtype.itemsize for a in weights)
    # per batch-row VMEM: x / out tiles (double-buffered) + f32/bf16 temps
    per_row = (2 * input_dim * (x_itemsize + out_itemsize)
               + 6 * (2 * hidden_dim + input_dim))

    n16 = _round_up(max(n, 16), 16)
    if batch_tile is None:
        avail = budget - resident
        if avail < per_row * 16:
            # TODO(synk): K/N weight tiling fallback; shrink the batch tile for now.
            batch_tile = 16
        else:
            batch_tile = int(min(2048, avail // per_row))
        batch_tile = max(16, (batch_tile // 16) * 16)
        batch_tile = min(batch_tile, n16)
        if num_tc > 1:
            # >= 2 grid steps so megacore parts can shard the parallel batch axis
            half = _round_up(max(n16 // 2, 16), 16)
            batch_tile = min(batch_tile, half)
    else:
        batch_tile = max(8, _round_up(int(batch_tile), 8))

    # ragged batch: pad N (rows only) instead of constraining batch_tile | n
    n_pad = _round_up(n, batch_tile)
    if n_pad != n:
        x_p = jnp.pad(x_p, ((0, n_pad - n), (0, 0)))

    grid = (n_pad // batch_tile,)

    vmem_limit = resident + batch_tile * per_row + (8 << 20)
    vmem_limit = max(int(vmem_limit), 32 << 20)
    vmem_limit = min(int(vmem_limit), int(vmem_cap * 0.9))

    def rep_spec(a):  # full-array block, constant index across the batch grid
        return pl.BlockSpec(a.shape, lambda i: (0, 0))

    out = pl.pallas_call(
        _autoencoder_kernel,
        out_shape=jax.ShapeDtypeStruct((n_pad, input_dim), out_dtype),
        grid_spec=pltpu.PrefetchScalarGridSpec(
            num_scalar_prefetch=0,
            grid=grid,
            in_specs=[
                pl.BlockSpec((batch_tile, input_dim), lambda i: (i, 0)),
                rep_spec(w1), rep_spec(b1),
                rep_spec(w23), rep_spec(b23),
                rep_spec(w4), rep_spec(b4),
            ],
            out_specs=pl.BlockSpec((batch_tile, input_dim), lambda i: (i, 0)),
        ),
        compiler_params=pltpu.CompilerParams(
            dimension_semantics=("parallel",),
            vmem_limit_bytes=vmem_limit),
    )(x_p, w1, b1, w23, b23, w4, b4)

    return out[:n, :]


def init_params(key, input_dim, latent_dim, hidden_dim):
    """Mimics PyTorch nn.Linear default init (U[-1/sqrt(fan_in), 1/sqrt(fan_in)])."""
    def linear(k, fan_in, fan_out):
        kw, kb = jax.random.split(k)
        bound = 1.0 / jnp.sqrt(jnp.float32(fan_in))
        w = jax.random.uniform(kw, (fan_in, fan_out), jnp.float32, -bound, bound)
        b = jax.random.uniform(kb, (1, fan_out), jnp.float32, -bound, bound)
        return w, b

    k1, k2, k3, k4 = jax.random.split(key, 4)
    w1, b1 = linear(k1, input_dim, hidden_dim)   # encoder Linear 1
    w2, b2 = linear(k2, hidden_dim, latent_dim)  # encoder Linear 2
    w3, b3 = linear(k3, latent_dim, hidden_dim)  # decoder Linear 1
    w4, b4 = linear(k4, hidden_dim, input_dim)   # decoder Linear 2
    return dict(w1=w1, b1=b1, w2=w2, b2=b2, w3=w3, b3=b3, w4=w4, b4=b4)


def reference_forward_f32(x, p):
    """Pure-f32 JAX reference of the PyTorch module (no fold, separate linears)."""
    neg = _NEG_SLOPE
    h = x @ p["w1"] + p["b1"]
    h = jnp.where(h > 0, h, neg * h)
    z = h @ p["w2"] + p["b2"]
    d = z @ p["w3"] + p["b3"]
    d = jnp.where(d > 0, d, neg * d)
    y = d @ p["w4"] + p["b4"]
    y = jnp.where(y > 0, y, _ELU_ALPHA * (jnp.exp(jnp.minimum(y, 0.0)) - 1.0)) + _ELU_BETA
    return y


def reference_forward_kernel_numerics(x, p):
    """Reference mirroring kernel numerics: folded W2@W3, bf16 MXU operands, f32 acc."""
    def mm(a, w):
        return jnp.dot(a.astype(jnp.bfloat16), w.astype(jnp.bfloat16),
                       preferred_element_type=jnp.float32)
    w23 = p["w2"] @ p["w3"]
    b23 = p["b2"] @ p["w3"] + p["b3"]
    neg = _NEG_SLOPE
    h = mm(x, p["w1"]) + p["b1"]
    h = jnp.where(h > 0, h, neg * h)
    d = mm(h, w23) + b23
    d = jnp.where(d > 0, d, neg * d)
    y = mm(d, p["w4"]) + p["b4"]
    y = jnp.where(y > 0, y, _ELU_ALPHA * (jnp.exp(jnp.minimum(y, 0.0)) - 1.0)) + _ELU_BETA
    return y


if __name__ == "__main__":
    key = jax.random.PRNGKey(0)
    kx, kp = jax.random.split(key)

    # Small shapes consistent with the module's forward.
    batch = 16
    input_dim = 32
    latent_dim = 8
    hidden_dim = 64

    x = jax.random.normal(kx, (batch, input_dim), dtype=jnp.float32)
    params = init_params(kp, input_dim, latent_dim, hidden_dim)

    out = autoencoder_matrix_forward(x, params)
    out = jax.block_until_ready(out)
    assert out.shape == (batch, input_dim)

    ref_kn = reference_forward_kernel_numerics(x, params)   # same numerics as kernel
    ref_f32 = reference_forward_f32(x, params)               # exact module semantics
    assert jnp.allclose(out, ref_kn, atol=1e-3, rtol=1e-3), "mismatch vs kernel-numerics reference"
    assert jnp.allclose(out, ref_f32, atol=5e-2, rtol=5e-2), "mismatch vs f32 reference"

    print("KERNEL_OK")
</pallas_src>

<mosaic_0001>
module attributes {stable_mosaic.version = 11 : i64} {
  func.func @_autoencoder_kernel(%arg0: i32, %arg1: memref<16x32xf32, #tpu.memory_space<vmem>>, %arg2: memref<32x64xbf16, #tpu.memory_space<vmem>>, %arg3: memref<1x64xf32, #tpu.memory_space<vmem>>, %arg4: memref<64x64xbf16, #tpu.memory_space<vmem>>, %arg5: memref<1x64xf32, #tpu.memory_space<vmem>>, %arg6: memref<64x32xbf16, #tpu.memory_space<vmem>>, %arg7: memref<1x32xf32, #tpu.memory_space<vmem>>, %arg8: memref<16x32xf32, #tpu.memory_space<vmem>>) attributes {dimension_semantics = [#tpu.dimension_semantics<parallel>], iteration_bounds = array<i64: 1>, scalar_prefetch = 0 : i64, scratch_operands = 0 : i64, tpu.core_type = #tpu.core_type<tc>, window_params = [{transform_indices = @transform_0, window_bounds = array<i64: 16, 32>}, {pipeline_mode = #tpu.pipeline_mode<synchronous>, transform_indices = @transform_1, window_bounds = array<i64: 32, 64>}, {pipeline_mode = #tpu.pipeline_mode<synchronous>, transform_indices = @transform_2, window_bounds = array<i64: 1, 64>}, {pipeline_mode = #tpu.pipeline_mode<synchronous>, transform_indices = @transform_3, window_bounds = array<i64: 64, 64>}, {pipeline_mode = #tpu.pipeline_mode<synchronous>, transform_indices = @transform_4, window_bounds = array<i64: 1, 64>}, {pipeline_mode = #tpu.pipeline_mode<synchronous>, transform_indices = @transform_5, window_bounds = array<i64: 64, 32>}, {pipeline_mode = #tpu.pipeline_mode<synchronous>, transform_indices = @transform_6, window_bounds = array<i64: 1, 32>}, {transform_indices = @transform_7, window_bounds = array<i64: 16, 32>}]} {
    %c0 = arith.constant 0 : index
    %c0_0 = arith.constant 0 : index
    %0 = vector.load %arg1[%c0, %c0_0] : memref<16x32xf32, #tpu.memory_space<vmem>>, vector<16x32xf32>
    %1 = arith.truncf %0 : vector<16x32xf32> to vector<16x32xbf16>
    %c0_1 = arith.constant 0 : index
    %c0_2 = arith.constant 0 : index
    %2 = vector.load %arg2[%c0_1, %c0_2] : memref<32x64xbf16, #tpu.memory_space<vmem>>, vector<32x64xbf16>
    %cst = arith.constant dense<0.000000e+00> : vector<16x64xf32>
    %3 = tpu.matmul %1, %2, %cst {dimension_numbers = #tpu.dot_dimension_numbers<[1], [0], [0], [1], [0, 0, 1, 1], [], []>} : vector<16x32xbf16>, vector<32x64xbf16>, vector<16x64xf32> -> vector<16x64xf32>
    %c0_3 = arith.constant 0 : index
    %c0_4 = arith.constant 0 : index
    %4 = vector.load %arg3[%c0_3, %c0_4] : memref<1x64xf32, #tpu.memory_space<vmem>>, vector<1x64xf32>
    %5 = vector.broadcast %4 : vector<1x64xf32> to vector<16x64xf32>
    %6 = arith.addf %3, %5 : vector<16x64xf32>
    %cst_5 = arith.constant 0.000000e+00 : f32
    %7 = vector.broadcast %cst_5 : f32 to vector<16x64xf32>
    %8 = arith.cmpf ogt, %6, %7 : vector<16x64xf32>
    %cst_6 = arith.constant 0.00999999977 : f32
    %9 = vector.broadcast %cst_6 : f32 to vector<16x64xf32>
    %10 = arith.mulf %9, %6 : vector<16x64xf32>
    %11 = arith.select %8, %6, %10 : vector<16x64xi1>, vector<16x64xf32>
    %12 = arith.truncf %11 : vector<16x64xf32> to vector<16x64xbf16>
    %c0_7 = arith.constant 0 : index
    %c0_8 = arith.constant 0 : index
    %13 = vector.load %arg4[%c0_7, %c0_8] : memref<64x64xbf16, #tpu.memory_space<vmem>>, vector<64x64xbf16>
    %cst_9 = arith.constant dense<0.000000e+00> : vector<16x64xf32>
    %14 = tpu.matmul %12, %13, %cst_9 {dimension_numbers = #tpu.dot_dimension_numbers<[1], [0], [0], [1], [0, 0, 1, 1], [], []>} : vector<16x64xbf16>, vector<64x64xbf16>, vector<16x64xf32> -> vector<16x64xf32>
    %c0_10 = arith.constant 0 : index
    %c0_11 = arith.constant 0 : index
    %15 = vector.load %arg5[%c0_10, %c0_11] : memref<1x64xf32, #tpu.memory_space<vmem>>, vector<1x64xf32>
    %16 = vector.broadcast %15 : vector<1x64xf32> to vector<16x64xf32>
    %17 = arith.addf %14, %16 : vector<16x64xf32>
    %cst_12 = arith.constant 0.000000e+00 : f32
    %18 = vector.broadcast %cst_12 : f32 to vector<16x64xf32>
    %19 = arith.cmpf ogt, %17, %18 : vector<16x64xf32>
    %cst_13 = arith.constant 0.00999999977 : f32
    %20 = vector.broadcast %cst_13 : f32 to vector<16x64xf32>
    %21 = arith.mulf %20, %17 : vector<16x64xf32>
    %22 = arith.select %19, %17, %21 : vector<16x64xi1>, vector<16x64xf32>
    %23 = arith.truncf %22 : vector<16x64xf32> to vector<16x64xbf16>
    %c0_14 = arith.constant 0 : index
    %c0_15 = arith.constant 0 : index
    %24 = vector.load %arg6[%c0_14, %c0_15] : memref<64x32xbf16, #tpu.memory_space<vmem>>, vector<64x32xbf16>
    %cst_16 = arith.constant dense<0.000000e+00> : vector<16x32xf32>
    %25 = tpu.matmul %23, %24, %cst_16 {dimension_numbers = #tpu.dot_dimension_numbers<[1], [0], [0], [1], [0, 0, 1, 1], [], []>} : vector<16x64xbf16>, vector<64x32xbf16>, vector<16x32xf32> -> vector<16x32xf32>
    %c0_17 = arith.constant 0 : index
    %c0_18 = arith.constant 0 : index
    %26 = vector.load %arg7[%c0_17, %c0_18] : memref<1x32xf32, #tpu.memory_space<vmem>>, vector<1x32xf32>
    %27 = vector.broadcast %26 : vector<1x32xf32> to vector<16x32xf32>
    %28 = arith.addf %25, %27 : vector<16x32xf32>
    %cst_19 = arith.constant 0.000000e+00 : f32
    %29 = vector.broadcast %cst_19 : f32 to vector<16x32xf32>
    %30 = arith.cmpf ogt, %28, %29 : vector<16x32xf32>
    %cst_20 = arith.constant 0.000000e+00 : f32
    %31 = vector.broadcast %cst_20 : f32 to vector<16x32xf32>
    %32 = arith.minimumf %28, %31 : vector<16x32xf32>
    %33 = math.exp %32 : vector<16x32xf32>
    %cst_21 = arith.constant 1.000000e+00 : f32
    %34 = vector.broadcast %cst_21 : f32 to vector<16x32xf32>
    %35 = arith.subf %33, %34 : vector<16x32xf32>
    %cst_22 = arith.constant 0.00999999977 : f32
    %36 = vector.broadcast %cst_22 : f32 to vector<16x32xf32>
    %37 = arith.mulf %36, %35 : vector<16x32xf32>
    %38 = arith.select %30, %28, %37 : vector<16x32xi1>, vector<16x32xf32>
    %cst_23 = arith.constant 0.00999999977 : f32
    %39 = vector.broadcast %cst_23 : f32 to vector<16x32xf32>
    %40 = arith.addf %38, %39 : vector<16x32xf32>
    %c0_24 = arith.constant 0 : index
    %c0_25 = arith.constant 0 : index
    %41 = vector.load %arg8[%c0_24, %c0_25] : memref<16x32xf32, #tpu.memory_space<vmem>>, vector<16x32xf32>
    tpu.vector_store %arg8[%c0_24, %c0_25], %40 {strides = array<i32>} : memref<16x32xf32, #tpu.memory_space<vmem>>, vector<16x32xf32>,
    return
  }
  func.func @transform_0(%arg0: i32) -> (i32, i32) {
    %c0_i32 = arith.constant 0 : i32
    %c0_i32_0 = arith.constant 0 : i32
    return %arg0, %c0_i32 : i32, i32
  }
  func.func @transform_1(%arg0: i32) -> (i32, i32) {
    %c0_i32 = arith.constant 0 : i32
    %c0_i32_0 = arith.constant 0 : i32
    %c0_i32_1 = arith.constant 0 : i32
    return %c0_i32, %c0_i32_0 : i32, i32
  }
  func.func @transform_2(%arg0: i32) -> (i32, i32) {
    %c0_i32 = arith.constant 0 : i32
    %c0_i32_0 = arith.constant 0 : i32
    %c0_i32_1 = arith.constant 0 : i32
    return %c0_i32, %c0_i32_0 : i32, i32
  }
  func.func @transform_3(%arg0: i32) -> (i32, i32) {
    %c0_i32 = arith.constant 0 : i32
    %c0_i32_0 = arith.constant 0 : i32
    %c0_i32_1 = arith.constant 0 : i32
    return %c0_i32, %c0_i32_0 : i32, i32
  }
  func.func @transform_4(%arg0: i32) -> (i32, i32) {
    %c0_i32 = arith.constant 0 : i32
    %c0_i32_0 = arith.constant 0 : i32
    %c0_i32_1 = arith.constant 0 : i32
    return %c0_i32, %c0_i32_0 : i32, i32
  }
  func.func @transform_5(%arg0: i32) -> (i32, i32) {
    %c0_i32 = arith.constant 0 : i32
    %c0_i32_0 = arith.constant 0 : i32
    %c0_i32_1 = arith.constant 0 : i32
    return %c0_i32, %c0_i32_0 : i32, i32
  }
  func.func @transform_6(%arg0: i32) -> (i32, i32) {
    %c0_i32 = arith.constant 0 : i32
    %c0_i32_0 = arith.constant 0 : i32
    %c0_i32_1 = arith.constant 0 : i32
    return %c0_i32, %c0_i32_0 : i32, i32
  }
  func.func @transform_7(%arg0: i32) -> (i32, i32) {
    %c0_i32 = arith.constant 0 : i32
    %c0_i32_0 = arith.constant 0 : i32
    return %arg0, %c0_i32 : i32, i32
  }
}

</mosaic_0001>

<bundles_post_ra>
// kernel: tpu_custom_call.1
= control target key start
LH: loop header
LB: loop body
LE: loop exit
PB: predicated region body
PF: predicated region fallthrough
CT: control target
= control target key end

     0   :  { %12 = vsyncpa [#allocation3], 0  ;;  %s581_s0 = inlined_call_operand.vmem [shape: f32[16,32], index: 0, kind: input, shape index: {}]   ;;  %s582_s1 = inlined_call_operand.hbm [shape: bf16[32,64], index: 1, kind: input, shape index: {}]   ;;  %s583_s2 = inlined_call_operand.vmem [shape: f32[1,64], index: 2, kind: input, shape index: {}]   ;;  %s584_s3 = inlined_call_operand.vmem [shape: bf16[64,64], index: 3, kind: input, shape index: {}]   ;;  %s585_s4 = inlined_call_operand.vmem [shape: f32[1,64], index: 4, kind: input, shape index: {}]   ;;  %s586_s5 = inlined_call_operand.vmem [shape: bf16[64,32], index: 5, kind: input, shape index: {}]   ;;  %s587_s6 = inlined_call_operand.vmem [shape: f32[1,32], index: 6, kind: input, shape index: {}]   ;;  %s588_s7 = inlined_call_operand.hbm [shape: f32[16,32], index: 7, kind: output, shape index: {}]  }
   0x1   :  { %13 = vsyncpa [#allocation4], 0  ;;  %s462_s24 = smov [#allocation2]   ;;  %s414_s28 = scalar_lea.hbm %s582_s1, 256 }
   0x2   :  { %s21_s25 = sshll.u32 %s462_s24, 4  ;;  %p415_p0 = scmp.ne.s32.totalorder %s582_s1, %s414_s28  ;;  %s22_s25 = int_to_ptr.vmem [resolvable:$true] %s21_s25 }
   0x3   :  { %p418_p1 = scmp.lt.u32.totalorder %s414_s28, %s582_s1 }
   0x5   :  { %p420_p2 = pnand %p418_p1, %p415_p0 }
   0x7   :  { %423 = shalt.err (!%p420_p2)
}
   0x8   :  { %s424_s10 = scalar_lea.vmem %s22_s25, 256  ;;  %p429_p4 = scmp.lt.s32.totalorder %s22_s25, %s22_s25 }
   0x9   :  { %p425_p3 = scmp.ne.s32.totalorder %s22_s25, %s424_s10  ;;  %p430_p5 = scmp.lt.s32.totalorder %s424_s10, %s424_s10 }
   0xb   :  { %p431_p6 = por %p430_p5, %p429_p4 }
   0xd   :  { %p432_p7 = pnand %p431_p6, %p425_p3 }
   0xf   :  { %435 = shalt.err (!%p432_p7)
}
  0x10   :  { %s463_s11 = smov 64   ;;  %s464_s12 = smov 4  }
  0x11   :  { %27 = dma.hbm_to_vmem [thread:$0]  %s582_s1, 256, %s22_s25, [#allocation3], %s463_s11, %s463_s11, %s464_s12  }
  0x12   :  { %458 = dma.done.wait [#allocation3], 256  }
  0x13   :  { %459 = vsyncadd [#allocation3], 4294967040  ;;  %v465_v0 = vmov 0.0   ;;  %vm466_vm0 = vmmov 0   ;;  %v400_v1 = vld [vmem:[#allocation2] sm:$0xff]   ;;  %v401_v2 = vld [vmem:[#allocation2 + $0x8] sm:$0xff]  }
  0x14   :  { %360 = vmatprep.subr.bf16.mxu0 %v465_v0  ;;  %364 = vmatprep.mubr.msk.bf16.mxu0 %vm466_vm0, %v465_v0  ;;  %v42_v3 = vld [vmem:[%s581_s0] sm:$0xff]  ;;  %v43_v4 = vld [vmem:[%s581_s0 + $0x8] sm:$0xff]  ;;  %vm68_vm1 = vcmask 261120   ;;  %v404_v8 = vld [vmem:[%s584_s3 + $0x10] sm:$0xff]   ;;  %vm159_vm4 = vcmask 523264  }
  0x15   :  { %368 = vmatprep.subr.bf16.mxu1 %v465_v0  ;;  %376 = vmatprep.mubr.msk.bf16.mxu1 %vm466_vm0, %v465_v0  ;;  %v402_v5 = vld [vmem:[%s584_s3] sm:$0xff]   ;;  %v403_v6 = vld [vmem:[%s584_s3 + $0x8] sm:$0xff]   ;;  %v44_v7 = vpack.c.bf16 %v43_v4, %v42_v3  ;;  %v405_v9 = vld [vmem:[%s584_s3 + $0x18] sm:$0xff]  }
  0x16   :  { %361 = vmatpush3.bf16.msra.mxu0 %v400_v1  ;;  %369 = vmatpush3.bf16.msra.mxu1 %v402_v5  ;;  %v406_v10 = vld [vmem:[%s586_s5] sm:$0xff]   ;;  %v407_v11 = vld [vmem:[%s586_s5 + $0x8] sm:$0xff]   ;;  %v408_v24 = vld [vmem:[%s586_s5 + $0x10] sm:$0xff]  }
  0x17   :  { %362 = vmatprep.subr.bf16.mxu0 %v465_v0  ;;  %370 = vmatprep.subr.bf16.mxu1 %v465_v0  ;;  %v329_v12 = vld [vmem:[%s583_s2] ss:$0 sm:$0xff]  ;;  %v409_v25 = vld [vmem:[%s586_s5 + $0x18] sm:$0xff]  }
  0x18   :  { %v333_v26 = vld [vmem:[%s585_s4] ss:$0 sm:$0xff]  ;;  %s467_s4 = smov [#allocation5]  }
  0x19   :  { %v339_v38 = vld [vmem:[%s587_s6] ss:$0 sm:$0xff]  ;;  %s317_s6 = sshll.u32 %s467_s4, 4  ;;  %s318_s6 = int_to_ptr.vmem [resolvable:$true] %s317_s6 }
  0x1a   :  { %363 = vmatpush3.bf16.msra.mxu0 %v401_v2  ;;  %371 = vmatpush3.bf16.msra.mxu1 %v403_v6  ;;  %s436_s13 = scalar_lea.vmem %s318_s6, 256  ;;  %p441_p9 = scmp.lt.s32.totalorder %s318_s6, %s318_s6 }
  0x1b   :  { %380 = vmatprep.subr.bf16.mxu0 %v465_v0  ;;  %372 = vmatprep.subr.bf16.mxu1 %v465_v0  ;;  %p437_p8 = scmp.ne.s32.totalorder %s318_s6, %s436_s13  ;;  %p442_p10 = scmp.lt.s32.totalorder %s436_s13, %s436_s13 }
  0x1d   :  { %365 = vmatmul.mubr.msk.bf16.vlgmr.msra.gmra.mrb[0].mxu0 %vm68_vm1, %v44_v7  ;;  %p443_p11 = por %p442_p10, %p441_p9 }
  0x1e   :  { %388 = vmatprep.mubr.msk.bf16.mxu0 %vm466_vm0, %v465_v0  ;;  %373 = vmatpush3.bf16.msra.mxu1 %v404_v8 }
  0x1f   :  { %374 = vmatprep.subr.bf16.mxu1 %v465_v0  ;;  %381 = vmatpush3.bf16.msra.mxu0 %v406_v10  ;;  %p444_p12 = pnand %p443_p11, %p437_p8 }
  0x20   :  { %382 = vmatprep.subr.bf16.mxu0 %v465_v0 }
  0x22   :  { %375 = vmatpush3.bf16.msra.mxu1 %v405_v9 }
  0x23   :  { %383 = vmatpush3.bf16.msra.mxu0 %v407_v11 }
  0x24   :  { %384 = vmatprep.subr.bf16.mxu0 %v465_v0 }
  0x27   :  { %385 = vmatpush3.bf16.msra.mxu0 %v408_v24 }
  0x28   :  { %386 = vmatprep.subr.bf16.mxu0 %v465_v0 }
  0x2b   :  { %387 = vmatpush3.bf16.msra.mxu0 %v409_v25 }
  0xf0   :  { %v106_v13 = vpop.f32.mrb[0].mxu0 }
  0xf1   :  { %v107_v14 = vadd.f32 %v329_v12, %v106_v13  ;;  %v366_v15 = vpop.f32.mrb[1].mxu0 }
  0xf2   :  { %v109_v16 = vpop.f32.mrb[2].mxu0 }
  0xf3   :  { %v115_v17 = vmul.f32 0.01, %v107_v14  ;;  %v110_v18 = vadd.f32 %v329_v12, %v109_v16  ;;  %v367_v19 = vpop.f32.mrb[3].mxu0  ;;  %vm113_vm2 = vcmp.gt.f32.partialorder %v107_v14, 0.0 }
  0xf5   :  { %vm114_vm3 = vcmp.gt.f32.partialorder %v110_v18, 0.0  ;;  %v116_v20 = vmul.f32 0.01, %v110_v18  ;;  %v117_v21 = vsel %vm113_vm2, %v107_v14, %v115_v17 }
  0xf7   :  { %v118_v22 = vsel %vm114_vm3, %v110_v18, %v116_v20 }
  0xf8   :  { %v119_v23 = vpack.c.bf16 %v118_v22, %v117_v21 }
  0xfa   :  { %377 = vmatmul.mubr.msk.bf16.vlgmr.msra.gmra.mrb[0].mxu1 %vm159_vm4, %v119_v23 }
 0x1cd   :  { %v197_v27 = vpop.f32.mrb[0].mxu1 }
 0x1ce   :  { %v198_v28 = vadd.f32 %v333_v26, %v197_v27  ;;  %v378_v29 = vpop.f32.mrb[1].mxu1 }
 0x1cf   :  { %v200_v30 = vpop.f32.mrb[2].mxu1 }
 0x1d0   :  { %v206_v31 = vmul.f32 0.01, %v198_v28  ;;  %v201_v32 = vadd.f32 %v333_v26, %v200_v30  ;;  %v379_v33 = vpop.f32.mrb[3].mxu1  ;;  %vm204_vm5 = vcmp.gt.f32.partialorder %v198_v28, 0.0 }
 0x1d2   :  { %vm205_vm6 = vcmp.gt.f32.partialorder %v201_v32, 0.0  ;;  %v207_v34 = vmul.f32 0.01, %v201_v32  ;;  %v208_v35 = vsel %vm204_vm5, %v198_v28, %v206_v31 }
 0x1d4   :  { %v209_v36 = vsel %vm205_vm6, %v201_v32, %v207_v34 }
 0x1d5   :  { %v210_v37 = vpack.c.bf16 %v209_v36, %v208_v35 }
 0x1d7   :  { %389 = vmatmul.mubr.msk.bf16.vlgmr.msra.gmra.mrb[4].mxu0 %vm159_vm4, %v210_v37 }
 0x2aa   :  { %v287_v39 = vpop.f32.mrb[4].mxu0 }
 0x2ab   :  { %v288_v40 = vadd.f32 %v339_v38, %v287_v39  ;;  %v390_v41 = vpop.f32.mrb[5].mxu0 }
 0x2ac   :  { %v290_v42 = vpop.f32.mrb[6].mxu0 }
 0x2ad   :  { %v296_v43 = vmin.f32 %v288_v40, 0.0  ;;  %v291_v44 = vadd.f32 %v339_v38, %v290_v42  ;;  %v391_v45 = vpop.f32.mrb[7].mxu0  ;;  %vm294_vm7 = vcmp.gt.f32.partialorder %v288_v40, 0.0 }
 0x2af   :  { %v298_v46 = vmul.f32 1.442695, %v296_v43  ;;  %v297_v47 = vmin.f32 %v291_v44, 0.0  ;;  %vm295_vm8 = vcmp.gt.f32.partialorder %v291_v44, 0.0 }
 0x2b1   :  { %410 = vpow2.f32 %v298_v46  ;;  %v300_v48 = vmul.f32 1.442695, %v297_v47 }
 0x2b3   :  { %412 = vpow2.f32 %v300_v48 }
 0x2bb   :  { %v411_v49 = vpop.eup %410 }
 0x2bc   :  { %v345_v50 = vadd.f32 -1.0, %v411_v49 }
 0x2bd   :  { %v413_v51 = vpop.eup %412 }
 0x2be   :  { %v304_v52 = vmul.f32 0.01, %v345_v50  ;;  %v346_v53 = vadd.f32 -1.0, %v413_v51 }
 0x2c0   :  { %v306_v54 = vsel %vm294_vm7, %v288_v40, %v304_v52  ;;  %v305_v55 = vmul.f32 0.01, %v346_v53 }
 0x2c1   :  { %v308_v56 = vadd.f32 0.01, %v306_v54 }
 0x2c2   :  { %v307_v57 = vsel %vm295_vm8, %v291_v44, %v305_v55 }
 0x2c3   :  { %310 = vst.msk [vmem:[#allocation5] sm:$0xff] %vm68_vm1, %v308_v56  ;;  %v309_v58 = vadd.f32 0.01, %v307_v57 }
 0x2c5   :  { %311 = vst.msk [vmem:[#allocation5 + $0x8] sm:$0xff] %vm68_vm1, %v309_v58 }
 0x2c6   :  { %447 = shalt.err (!%p444_p12)
}
 0x2c7   :  { %s448_s16 = scalar_lea.hbm %s588_s7, 256 }
 0x2c8   :  { %p449_p13 = scmp.ne.s32.totalorder %s588_s7, %s448_s16  ;;  %p452_p0 = scmp.lt.u32.totalorder %s448_s16, %s588_s7 }
 0x2ca   :  { %p454_p1 = pnand %p452_p0, %p449_p13 }
 0x2cc   :  { %457 = shalt.err (!%p454_p1)
}
 0x2cd   :  { %s468_s20 = smov 128   ;;  %s469_s21 = smov 8  }
 0x2ce   :  { %323 = dma.vmem_to_hbm [thread:$0]  %s318_s6, 256, %s588_s7, [#allocation4], %s468_s20, %s468_s20, %s469_s21  }
 0x2cf   :  { %460 = dma.done.wait [#allocation4], 256  }
 0x2d0   :  { %461 = vsyncadd [#allocation4], 4294967040 }
 0x2d1   :  { %327 = vsyncpa [#allocation3], 1 }
 0x2d2   :  { %328 = vsyncpa [#allocation4], 1 }

</bundles_post_ra>
